<compile_context>
chip_gen: v6e
topology: v6e:2x2x1
jax: 0.10.0
libtpu: 0.0.40
codegen_flags: <defaults>
</compile_context>

<pallas_src>
import jax
import jax.numpy as jnp
from jax.experimental import pallas as pl
from jax.experimental.pallas import tpu as pltpu

_LANE = 128
_SUBLANE = 8


def _round_up(a: int, b: int) -> int:
    return ((a + b - 1) // b) * b


def _mlp_kernel(x_ref, w1_ref, b1_ref, w2_ref, b2_ref, o_ref):
    # x_ref:  (TB, D)  batch tile           w1_ref: (D, H)  VMEM-resident
    # b1_ref: (1, H)   VMEM-resident        w2_ref: (1, H)  fc2 weights as a row
    # b2_ref: (1,)     SMEM scalar          o_ref:  (TB, 1)
    #
    # fc1 + ReLU: native-dtype MXU matmul with f32 accumulation.
    h = jnp.dot(x_ref[...], w1_ref[...], preferred_element_type=jnp.float32)
    h = jnp.maximum(h + b1_ref[...].astype(jnp.float32), 0.0)
    # fc2: (TB, H) @ (H, 1) would be an N=1 MXU matmul (wastes the array);
    # do it on the VPU as an elementwise multiply + lane-axis reduction.
    out = jnp.sum(h * w2_ref[...].astype(jnp.float32), axis=-1, keepdims=True)
    o_ref[...] = (out + b2_ref[0]).astype(o_ref.dtype)


def two_layer_regressor(x, w1, b1, w2, b2, *, tile_vmem_bytes=24 << 20):
    """Forward pass: relu(x @ w1 + b1) @ w2 + b2 -> (B, 1) float32.

    x:  (B, D) float dtype (f32 matches x.float(); bf16 callers get bf16 MXU)
    w1: (D, H)  = fc1.weight.T    b1: (H,)
    w2: (H, 1)  = fc2.weight.T    b2: (1,)
    """
    B, D = x.shape
    H = w1.shape[1]
    x_isz = jnp.dtype(x.dtype).itemsize
    w_isz = jnp.dtype(w1.dtype).itemsize

    # ---- Batch tile sizing (bytes-driven) -----------------------------------
    # VMEM bytes per batch row (lane dim of each tile pads to 128):
    #   x double-buffer:   2 * round_up(D, 128) * itemsize
    #   out double-buffer: 2 * 128 * 4      (last dim 1 still occupies a lane tile)
    d_pad = _round_up(D, _LANE)
    per_row_vmem = 2 * d_pad * x_isz + 2 * _LANE * 4
    tb_cap = max(_LANE, (tile_vmem_bytes // per_row_vmem) // _LANE * _LANE)
    # Keep >= 2 grid steps when B allows, so v7x's two TensorCores both get work.
    tb_half = max(_LANE, _round_up(pl.cdiv(B, 2), _LANE))
    tb = min(tb_cap, tb_half, _round_up(B, _LANE))
    grid_b = pl.cdiv(B, tb)  # non-divisible grid is fine: last tile's OOB rows
    #                          read garbage, their outputs are dropped.

    b1_row = b1.reshape(1, H)
    w2_row = w2.reshape(1, H)                     # fc2 weights as a lane-aligned row
    b2_s = b2.reshape(1).astype(jnp.float32)      # scalar, lives in SMEM

    # Explicit scoped-VMEM limit derived from the actual working set
    # (+4 MiB slack), floored at 16 MiB (<= every gen's default) and capped at
    # 48 MiB to leave headroom on v7x's 64 MiB physical VMEM.
    weights_vmem = 2 * (_round_up(D, _SUBLANE) * _round_up(H, _LANE) * w_isz) \
        + 2 * 2 * (_SUBLANE * _round_up(H, _LANE) * w_isz)
    tiles_vmem = tb * per_row_vmem
    vmem_limit = min(max(tiles_vmem + weights_vmem + (4 << 20), 16 << 20), 48 << 20)

    out = pl.pallas_call(
        _mlp_kernel,
        out_shape=jax.ShapeDtypeStruct((B, 1), jnp.float32),
        grid_spec=pltpu.PrefetchScalarGridSpec(
            num_scalar_prefetch=0,
            grid=(grid_b,),
            in_specs=[
                pl.BlockSpec((tb, D), lambda i: (i, 0)),            # x: batch-tiled
                pl.BlockSpec((D, H), lambda i: (0, 0)),             # w1: VMEM-resident
                pl.BlockSpec((1, H), lambda i: (0, 0)),             # b1: VMEM-resident
                pl.BlockSpec((1, H), lambda i: (0, 0)),             # w2 row: VMEM-resident
                pl.BlockSpec(memory_space=pltpu.MemorySpace.SMEM),  # b2: SMEM scalar
            ],
            out_specs=pl.BlockSpec((tb, 1), lambda i: (i, 0)),
        ),
        compiler_params=pltpu.CompilerParams(
            dimension_semantics=("parallel",),   # batch tiles are independent
            vmem_limit_bytes=vmem_limit,
        ),
    )(x, w1, b1_row, w2_row, b2_s)

    return out


if __name__ == "__main__":
    # Small shapes consistent with the module: input_dim=16, hidden_dim=32.
    # B=200 exercises >= 2 grid steps plus a non-divisible last tile.
    B, D, H = 200, 16, 32

    key = jax.random.PRNGKey(0)
    kx, kw1, kb1, kw2, kb2 = jax.random.split(key, 5)

    x = jax.random.normal(kx, (B, D), dtype=jnp.float32)
    w1 = jax.random.normal(kw1, (D, H), dtype=jnp.float32) * 0.1   # fc1.weight.T
    b1 = jax.random.normal(kb1, (H,), dtype=jnp.float32) * 0.1     # fc1.bias
    w2 = jax.random.normal(kw2, (H, 1), dtype=jnp.float32) * 0.1   # fc2.weight.T
    b2 = jax.random.normal(kb2, (1,), dtype=jnp.float32) * 0.1     # fc2.bias

    out = two_layer_regressor(x, w1, b1, w2, b2)
    out = jax.block_until_ready(out)

    # Reference check in plain JAX
    ref = jnp.maximum(x @ w1 + b1, 0.0) @ w2 + b2
    assert out.shape == (B, 1)
    assert jnp.allclose(out, ref, atol=1e-5, rtol=1e-5)

    print("KERNEL_OK")
</pallas_src>

<mosaic_0001>
module attributes {stable_mosaic.version = 11 : i64} {
  func.func @_mlp_kernel(%arg0: i32, %arg1: memref<128x16xf32, #tpu.memory_space<vmem>>, %arg2: memref<16x32xf32, #tpu.memory_space<vmem>>, %arg3: memref<1x32xf32, #tpu.memory_space<vmem>>, %arg4: memref<1x32xf32, #tpu.memory_space<vmem>>, %arg5: memref<1xf32, #tpu.memory_space<smem>>, %arg6: memref<128x1xf32, #tpu.memory_space<vmem>>) attributes {dimension_semantics = [#tpu.dimension_semantics<parallel>], iteration_bounds = array<i64: 2>, scalar_prefetch = 0 : i64, scratch_operands = 0 : i64, tpu.core_type = #tpu.core_type<tc>, window_params = [{transform_indices = @transform_0, window_bounds = array<i64: 128, 16>}, {pipeline_mode = #tpu.pipeline_mode<synchronous>, transform_indices = @transform_1, window_bounds = array<i64: 16, 32>}, {pipeline_mode = #tpu.pipeline_mode<synchronous>, transform_indices = @transform_2, window_bounds = array<i64: 1, 32>}, {pipeline_mode = #tpu.pipeline_mode<synchronous>, transform_indices = @transform_3, window_bounds = array<i64: 1, 32>}, {transform_indices = @transform_4, window_bounds = array<i64: 1>}, {transform_indices = @transform_5, window_bounds = array<i64: 128, 1>}]} {
    %c0 = arith.constant 0 : index
    %c0_0 = arith.constant 0 : index
    %0 = vector.load %arg1[%c0, %c0_0] : memref<128x16xf32, #tpu.memory_space<vmem>>, vector<128x16xf32>
    %c0_1 = arith.constant 0 : index
    %c0_2 = arith.constant 0 : index
    %1 = vector.load %arg2[%c0_1, %c0_2] : memref<16x32xf32, #tpu.memory_space<vmem>>, vector<16x32xf32>
    %cst = arith.constant dense<0.000000e+00> : vector<128x32xf32>
    %2 = tpu.matmul %0, %1, %cst {dimension_numbers = #tpu.dot_dimension_numbers<[1], [0], [0], [1], [0, 0, 1, 1], [], []>} : vector<128x16xf32>, vector<16x32xf32>, vector<128x32xf32> -> vector<128x32xf32>
    %c0_3 = arith.constant 0 : index
    %c0_4 = arith.constant 0 : index
    %3 = vector.load %arg3[%c0_3, %c0_4] : memref<1x32xf32, #tpu.memory_space<vmem>>, vector<1x32xf32>
    %4 = vector.broadcast %3 : vector<1x32xf32> to vector<128x32xf32>
    %5 = arith.addf %2, %4 : vector<128x32xf32>
    %cst_5 = arith.constant 0.000000e+00 : f32
    %6 = vector.broadcast %cst_5 : f32 to vector<128x32xf32>
    %7 = arith.maximumf %5, %6 : vector<128x32xf32>
    %c0_6 = arith.constant 0 : index
    %c0_7 = arith.constant 0 : index
    %8 = vector.load %arg4[%c0_6, %c0_7] : memref<1x32xf32, #tpu.memory_space<vmem>>, vector<1x32xf32>
    %9 = vector.broadcast %8 : vector<1x32xf32> to vector<128x32xf32>
    %10 = arith.mulf %7, %9 : vector<128x32xf32>
    %cst_8 = arith.constant dense<0.000000e+00> : vector<128xf32>
    %11 = vector.multi_reduction <add>, %10, %cst_8 [1] : vector<128x32xf32> to vector<128xf32>
    %12 = vector.shape_cast %11 : vector<128xf32> to vector<128x1xf32>
    %c0_9 = arith.constant 0 : index
    %13 = memref.load %arg5[%c0_9] : memref<1xf32, #tpu.memory_space<smem>>
    %14 = vector.broadcast %13 : f32 to vector<128x1xf32>
    %15 = arith.addf %12, %14 : vector<128x1xf32>
    %c0_10 = arith.constant 0 : index
    %c0_11 = arith.constant 0 : index
    %16 = vector.load %arg6[%c0_10, %c0_11] : memref<128x1xf32, #tpu.memory_space<vmem>>, vector<128x1xf32>
    tpu.vector_store %arg6[%c0_10, %c0_11], %15 {strides = array<i32>} : memref<128x1xf32, #tpu.memory_space<vmem>>, vector<128x1xf32>,
    return
  }
  func.func @transform_0(%arg0: i32) -> (i32, i32) {
    %c0_i32 = arith.constant 0 : i32
    %c0_i32_0 = arith.constant 0 : i32
    return %arg0, %c0_i32 : i32, i32
  }
  func.func @transform_1(%arg0: i32) -> (i32, i32) {
    %c0_i32 = arith.constant 0 : i32
    %c0_i32_0 = arith.constant 0 : i32
    %c0_i32_1 = arith.constant 0 : i32
    return %c0_i32, %c0_i32_0 : i32, i32
  }
  func.func @transform_2(%arg0: i32) -> (i32, i32) {
    %c0_i32 = arith.constant 0 : i32
    %c0_i32_0 = arith.constant 0 : i32
    %c0_i32_1 = arith.constant 0 : i32
    return %c0_i32, %c0_i32_0 : i32, i32
  }
  func.func @transform_3(%arg0: i32) -> (i32, i32) {
    %c0_i32 = arith.constant 0 : i32
    %c0_i32_0 = arith.constant 0 : i32
    %c0_i32_1 = arith.constant 0 : i32
    return %c0_i32, %c0_i32_0 : i32, i32
  }
  func.func @transform_4(%arg0: i32) -> i32 {
    %c0_i32 = arith.constant 0 : i32
    %c0_i32_0 = arith.constant 0 : i32
    return %c0_i32 : i32
  }
  func.func @transform_5(%arg0: i32) -> (i32, i32) {
    %c0_i32 = arith.constant 0 : i32
    %c0_i32_0 = arith.constant 0 : i32
    return %arg0, %c0_i32 : i32, i32
  }
}

</mosaic_0001>

<bundles_post_ra>
// kernel: tpu_custom_call.1
= control target key start
LH: loop header
LB: loop body
LE: loop exit
PB: predicated region body
PF: predicated region fallthrough
CT: control target
= control target key end

     0   :  { %s1421_s0 = inlined_call_operand.vmem [shape: f32[200,16], index: 0, kind: input, shape index: {}]   ;;  %s1422_s1 = inlined_call_operand.vmem [shape: f32[16,32], index: 1, kind: input, shape index: {}]   ;;  %s1423_s2 = inlined_call_operand.vmem [shape: f32[1,32], index: 2, kind: input, shape index: {}]   ;;  %s1424_s3 = inlined_call_operand.vmem [shape: f32[1,32], index: 3, kind: input, shape index: {}]   ;;  %s1425_s4 = inlined_call_operand.<no memory space> [shape: f32[1], index: 4, kind: input, shape index: {}]   ;;  %s1426_s5 = inlined_call_operand.vmem [shape: f32[200,1], index: 5, kind: output, shape index: {}]  }
   0x1   :  { %10 = sst [smem:[#allocation2]] %s1425_s4 }
   0x2   :  { %s1169_s20 = smov 0   ;;  %s1171_s21 = smov 0  }
   0x3   :  { %s1173_s22 = smov 0  }
   0x4 LB: > { %s1182_s4 = sadd.s32 4294967295, %s1102_s22   ;;  %s1184_s23 = sadd.s32 1, %s1102_s22   ;;  %s1102_s22 = sphi %s1173_s22, %s1433_s22   ;;  %s1098_s21 = sphi %s1171_s21, %s1432_s21   ;;  %s1094_s20 = sphi %s1169_s20, %s1431_s20  }
   0x5   : > { %s130_s24 = ssub.s32 %s1102_s22, %s1184_s23  ;;  %s133_s25 = sadd.s32 1, %s1098_s21 }
   0x6   : > { %p131_p0 = scmp.eq.s32.totalorder %s130_s24, 0  ;;  %p143_p1 = scmp.ne.s32.totalorder %s1098_s21, %s1094_s20 }
   0x7   : > { %p144_p2 = scmp.eq.s32.totalorder %s1182_s4, 1  ;;  %p868_p3 = scmp.ge.s32.totalorder %s1102_s22, 1 }
   0x8   : > { %s1192_s26 = scalar_select %p131_p0, %s1098_s21, %s133_s25  }
   0x9   : > { %p1194_p4 = por %p144_p2, %p143_p1  ;;  %p197_p5 = scmp.lt.s32.totalorder %s1102_s22, 3 }
   0xb   : > { %p198_p6 = pnand %p868_p3, %p197_p5 }
   0xc   : > { %s1205_s7 = sshll.u32 (!%p198_p6), %s1182_s4, 4  ;;  %s554_s17 = sld [smem:[#allocation2]] (!%p198_p6) }
   0xd   : > { %201 = sbr.rel (%p198_p6) target bundleno = 435 (0x1b3), region = 40  ;;  %p233_p7 = scmp.lt.s32.totalorder (!%p198_p6), %s1205_s7, 24 }
   0xe   : > { %s225_s18 = sand.u32 (!%p198_p6), 1, %s1094_s20  }
   0xf   : > { %s869_s19 = sshll.u32 (!%p198_p6), %s225_s18, 7 }
  0x10   : > { %s1287_s22 = scalar_lea.vmem (!%p198_p6), [#allocation3], %s869_s19  }
  0x12   : > { %v264_v0 = vld [vmem:[%s1422_s1 + $0x8] sm:$0xff]  ;;  %v263_v1 = vld [vmem:[%s1422_s1] sm:$0xff]  ;;  %s234_s8 = scalar_select %p233_p7, %s1205_s7, 24  ;;  %vm272_vm0 = vcmask 130048   ;;  %vm505_vm1 = vcmask 261120   ;;  %vm572_vm2 = vcmask 7168  }
  0x13   : > { %928 = vmatprep.subr.mxu0 %v264_v0  ;;  %956 = vmatprep.subr.mxu1 %v264_v0  ;;  %v1231_v18 = vld [vmem:[%s1423_s2] ss:$0 sm:$0xff]  ;;  %s597_s20 = ssub.s32 (%p1194_p4), 25, %s1205_s7  ;;  %s907_s24 = sshll.u32 (%p1194_p4), %s1182_s4, 7 }
  0x14   : > { %929 = vmatpush3.msra.mxu0 %v264_v0  ;;  %958 = vmatpush3.msra.mxu1 %v264_v0  ;;  %s871_s9 = sshll.u32 %s234_s8, 3  ;;  %v1240_v29 = vld [vmem:[%s1424_s3] ss:$0 sm:$0xff]  ;;  %p598_p8 = scmp.lt.s32.totalorder (%p1194_p4), %s597_s20, 16 }
  0x15   : > { %930 = vmatprep.subr.mxu0 %v263_v1  ;;  %957 = vmatprep.subr.mxu1 %v263_v1  ;;  %s236_s12 = scalar_lea.vmem %s1421_s0, %s871_s9  ;;  %s1328_s29 = scalar_lea.vmem (%p1194_p4), %s1426_s5, %s907_s24  }
  0x16   : > { %931 = vmatpush3.msra.mxu0 %v263_v1  ;;  %959 = vmatpush3.msra.mxu1 %v263_v1  ;;  %v247_v2 = vld [vmem:[%s236_s12] sm:$0xff]  ;;  %v248_v4 = vld [vmem:[%s236_s12 + $0x8] sm:$0xff]  ;;  %v249_v6 = vld [vmem:[%s236_s12 + $0x10] sm:$0xff] }
  0x17   : > { %v255_v3 = vld [vmem:[%s236_s12 + $0x40] sm:$0xff]  ;;  %932 = vmatprep.mubr.msk.f32.mxu0 %vm272_vm0, %v247_v2  ;;  %v256_v5 = vld [vmem:[%s236_s12 + $0x48] sm:$0xff]  ;;  %v257_v7 = vld [vmem:[%s236_s12 + $0x50] sm:$0xff] }
  0x18   : > { %944 = vmatprep.mubr.msk.f32.mxu1 %vm272_vm0, %v255_v3  ;;  %933 = vmatmul.mubr.msk.f32.vlgmr.msra.gmra.mxu0 %vm272_vm0, %v248_v4  ;;  %v250_v8 = vld [vmem:[%s236_s12 + $0x18] sm:$0xff]  ;;  %v251_v10 = vld [vmem:[%s236_s12 + $0x20] sm:$0xff]  ;;  %v252_v12 = vld [vmem:[%s236_s12 + $0x28] sm:$0xff] }
  0x19   : > { %945 = vmatmul.mubr.msk.f32.vlgmr.msra.gmra.mxu1 %vm272_vm0, %v256_v5  ;;  %935 = vmatprep.mubr.msk.f32.mxu0 %vm272_vm0, %v249_v6  ;;  %v258_v9 = vld [vmem:[%s236_s12 + $0x58] sm:$0xff]  ;;  %v259_v11 = vld [vmem:[%s236_s12 + $0x60] sm:$0xff]  ;;  %v260_v13 = vld [vmem:[%s236_s12 + $0x68] sm:$0xff] }
  0x1a   : > { %947 = vmatprep.mubr.msk.f32.mxu1 %vm272_vm0, %v257_v7  ;;  %v253_v14 = vld [vmem:[%s236_s12 + $0x30] sm:$0xff]  ;;  %v254_v16 = vld [vmem:[%s236_s12 + $0x38] sm:$0xff] }
  0x1b   : > { %v261_v15 = vld [vmem:[%s236_s12 + $0x70] sm:$0xff]  ;;  %v262_v17 = vld [vmem:[%s236_s12 + $0x78] sm:$0xff] }
  0x1c   : > { %936 = vmatmul.mubr.msk.f32.gmra.mxu0 %vm272_vm0, %v250_v8 }
  0x1d   : > { %948 = vmatmul.mubr.msk.f32.gmra.mxu1 %vm272_vm0, %v258_v9  ;;  %938 = vmatprep.mubr.msk.f32.mxu0 %vm272_vm0, %v251_v10 }
  0x1e   : > { %950 = vmatprep.mubr.msk.f32.mxu1 %vm272_vm0, %v259_v11 }
  0x20   : > { %939 = vmatmul.mubr.msk.f32.gmra.mxu0 %vm272_vm0, %v252_v12 }
  0x21   : > { %951 = vmatmul.mubr.msk.f32.gmra.mxu1 %vm272_vm0, %v260_v13  ;;  %941 = vmatprep.mubr.msk.f32.mxu0 %vm272_vm0, %v253_v14 }
  0x22   : > { %953 = vmatprep.mubr.msk.f32.mxu1 %vm272_vm0, %v261_v15 }
  0x24   : > { %942 = vmatmul.mubr.msk.f32.gmra.mxu0 %vm272_vm0, %v254_v16 }
  0x25   : > { %954 = vmatmul.mubr.msk.f32.gmra.mxu1 %vm272_vm0, %v262_v17 }
  0xd8   : > { %v934_v19 = vpop.f32.mrf.mxu0 }
  0xd9   : > { %v946_v20 = vpop.f32.mrf.mxu1  ;;  %v393_v21 = vadd.f32 %v934_v19, %v1231_v18 }
  0xda   : > { %v433_v22 = vadd.f32 %v946_v20, %v1231_v18  ;;  %v387_v23 = vpop.f32.mrf.mxu0 }
  0xdb   : > { %v427_v24 = vpop.f32.mrf.mxu1  ;;  %v467_v25 = vmax.f32 %v393_v21, 0.0  ;;  %v388_v27 = vadd.f32 %v1231_v18, %v387_v23 }
  0xdc   : > { %v475_v26 = vmax.f32 %v433_v22, 0.0  ;;  %v428_v28 = vadd.f32 %v1231_v18, %v427_v24  ;;  %v937_v30 = vpop.f32.mrf.mxu0 }
  0xdd   : > { %v949_v31 = vpop.f32.mrf.mxu1  ;;  %v466_v32 = vmax.f32 %v388_v27, 0.0  ;;  %v403_v33 = vadd.f32 %v937_v30, %v1231_v18  ;;  %v490_v38 = vmul.f32 %v1240_v29, %v467_v25 }
  0xde   : > { %v443_v34 = vadd.f32 %v949_v31, %v1231_v18  ;;  %v397_v35 = vpop.f32.mrf.mxu0  ;;  %v498_v36 = vmul.f32 %v1240_v29, %v475_v26  ;;  %v474_v39 = vmax.f32 %v428_v28, 0.0 }
  0xdf   : > { %v437_v37 = vpop.f32.mrf.mxu1  ;;  %v469_v40 = vmax.f32 %v403_v33, 0.0  ;;  %v398_v41 = vadd.f32 %v1231_v18, %v397_v35  ;;  %v509_v45 = vsel %vm505_vm1, %v490_v38, 0.0  ;;  %v489_v47 = vmul.f32 %v1240_v29, %v466_v32 }
  0xe0   : > { %v477_v42 = vmax.f32 %v443_v34, 0.0  ;;  %v533_v43 = vsel %vm505_vm1, %v498_v36, 0.0  ;;  %v438_v44 = vadd.f32 %v1231_v18, %v437_v37  ;;  %v940_v46 = vpop.f32.mrf.mxu0  ;;  %510 = vadd.xlane.f32.xlu0 %v509_v45  ;;  %v497_v54 = vmul.f32 %v1240_v29, %v474_v39 }
  0xe1   : > { %v952_v48 = vpop.f32.mrf.mxu1  ;;  %534 = vadd.xlane.f32.xlu1 %v533_v43  ;;  %v492_v49 = vmul.f32 %v1240_v29, %v469_v40  ;;  %v413_v53 = vadd.f32 %v940_v46, %v1231_v18  ;;  %v468_v55 = vmax.f32 %v398_v41, 0.0  ;;  %v506_v57 = vsel %vm505_vm1, %v489_v47, 0.0 }
  0xe2   : > { %v407_v50 = vpop.f32.mrf.mxu0  ;;  %v500_v51 = vmul.f32 %v1240_v29, %v477_v42  ;;  %v476_v56 = vmax.f32 %v438_v44, 0.0  ;;  %v453_v63 = vadd.f32 %v952_v48, %v1231_v18  ;;  %v530_v2 = vsel %vm505_vm1, %v497_v54, 0.0 }
  0xe3   : > { %v515_v52 = vsel %vm505_vm1, %v492_v49, 0.0  ;;  %v408_v58 = vadd.f32 %v1231_v18, %v407_v50  ;;  %v447_v59 = vpop.f32.mrf.mxu1  ;;  %v471_v62 = vmax.f32 %v413_v53, 0.0  ;;  %v491_v3 = vmul.f32 %v1240_v29, %v468_v55 }
  0xe4   : > { %507 = vadd.xlane.f32.xlu0 %v506_v57  ;;  %v943_v60 = vpop.f32.mrf.mxu0  ;;  %v539_v61 = vsel %vm505_vm1, %v500_v51, 0.0  ;;  %v448_v0 = vadd.f32 %v1231_v18, %v447_v59  ;;  %v499_v4 = vmul.f32 %v1240_v29, %v476_v56  ;;  %v479_v7 = vmax.f32 %v453_v63, 0.0 }
  0xe5   : > { %516 = vadd.xlane.f32.xlu1 %v515_v52  ;;  %v470_v1 = vmax.f32 %v408_v58, 0.0  ;;  %v955_v6 = vpop.f32.mrf.mxu1  ;;  %v423_v9 = vadd.f32 %v943_v60, %v1231_v18  ;;  %v494_v10 = vmul.f32 %v1240_v29, %v471_v62  ;;  %v512_v11 = vsel %vm505_vm1, %v491_v3, 0.0 }
  0xe6   : > { %v417_v5 = vpop.f32.mrf.mxu0  ;;  %v478_v8 = vmax.f32 %v448_v0, 0.0  ;;  %v536_v12 = vsel %vm505_vm1, %v499_v4, 0.0  ;;  %v463_v17 = vadd.f32 %v955_v6, %v1231_v18  ;;  %v502_v20 = vmul.f32 %v1240_v29, %v479_v7 }
  0xe7   : > { %v418_v13 = vadd.f32 %v1231_v18, %v417_v5  ;;  %v493_v14 = vmul.f32 %v1240_v29, %v470_v1  ;;  %v457_v15 = vpop.f32.mrf.mxu1  ;;  %v473_v16 = vmax.f32 %v423_v9, 0.0  ;;  %v521_v19 = vsel %vm505_vm1, %v494_v10, 0.0 }
  0xe8   : > { %531 = vadd.xlane.f32.xlu0 %v530_v2  ;;  %v458_v23 = vadd.f32 %v1231_v18, %v457_v15  ;;  %v501_v24 = vmul.f32 %v1240_v29, %v478_v8  ;;  %v481_v25 = vmax.f32 %v463_v17, 0.0  ;;  %v545_v26 = vsel %vm505_vm1, %v502_v20, 0.0 }
  0xe9   : > { %540 = vadd.xlane.f32.xlu1 %v539_v61  ;;  %v472_v21 = vmax.f32 %v418_v13, 0.0  ;;  %v518_v22 = vsel %vm505_vm1, %v493_v14, 0.0  ;;  %v496_v30 = vmul.f32 %v1240_v29, %v473_v16  ;;  %v555_v37 = vstv %s554_s17 }
  0xea   : > { %v480_v27 = vmax.f32 %v458_v23, 0.0  ;;  %v542_v28 = vsel %vm505_vm1, %v501_v24, 0.0  ;;  %v504_v33 = vmul.f32 %v1240_v29, %v481_v25 }
  0xeb   : > { %v495_v31 = vmul.f32 %v1240_v29, %v472_v21  ;;  %v527_v32 = vsel %vm505_vm1, %v496_v30, 0.0 }
  0xec   : > { %537 = vadd.xlane.f32.xlu0 %v536_v12  ;;  %v503_v34 = vmul.f32 %v1240_v29, %v480_v27  ;;  %v551_v35 = vsel %vm505_vm1, %v504_v33, 0.0 }
  0xed   : > { %513 = vadd.xlane.f32.xlu1 %v512_v11  ;;  %v524_v18 = vsel %vm505_vm1, %v495_v31, 0.0 }
  0xee   : > { %v548_v36 = vsel %vm505_vm1, %v503_v34, 0.0 }
  0xf0   : > { %519 = vadd.xlane.f32.xlu0 %v518_v22 }
  0xf1   : > { %522 = vadd.xlane.f32.xlu1 %v521_v19 }
  0xf4   : > { %543 = vadd.xlane.f32.xlu0 %v542_v28 }
  0xf5   : > { %546 = vadd.xlane.f32.xlu1 %v545_v26 }
  0xf8   : > { %525 = vadd.xlane.f32.xlu0 %v524_v18 }
  0xf9   : > { %528 = vadd.xlane.f32.xlu1 %v527_v32 }
  0xfc   : > { %549 = vadd.xlane.f32.xlu0 %v548_v36 }
  0xfd   : > { %552 = vadd.xlane.f32.xlu1 %v551_v35 }
 0x169   : > { %v511_v39 = vpop.xlane.xlu0 %510 }
 0x16a   : > { %v535_v38 = vpop.xlane.xlu1 %534  ;;  %v557_v41 = vadd.f32 %v555_v37, %v511_v39 }
 0x16b   : > { %v565_v40 = vadd.f32 %v555_v37, %v535_v38 }
 0x16c   : > { %574 = vst.msk [vmem:[%s1287_s22 + $0x8] sm:$0xff] %vm572_vm2, %v557_v41 }
 0x16d   : > { %582 = vst.msk [vmem:[%s1287_s22 + $0x48] sm:$0xff] %vm572_vm2, %v565_v40  ;;  %v508_v42 = vpop.xlane.xlu0 %507 }
 0x16e   : > { %v517_v29 = vpop.xlane.xlu1 %516  ;;  %v556_v44 = vadd.f32 %v555_v37, %v508_v42 }
 0x16f   : > { %v559_v43 = vadd.f32 %v555_v37, %v517_v29 }
 0x170   : > { %573 = vst.msk [vmem:[%s1287_s22] sm:$0xff] %vm572_vm2, %v556_v44 }
 0x171   : > { %576 = vst.msk [vmem:[%s1287_s22 + $0x18] sm:$0xff] %vm572_vm2, %v559_v43  ;;  %v532_v46 = vpop.xlane.xlu0 %531 }
 0x172   : > { %v541_v45 = vpop.xlane.xlu1 %540  ;;  %v564_v48 = vadd.f32 %v555_v37, %v532_v46 }
 0x173   : > { %v567_v47 = vadd.f32 %v555_v37, %v541_v45 }
 0x174   : > { %581 = vst.msk [vmem:[%s1287_s22 + $0x40] sm:$0xff] %vm572_vm2, %v564_v48 }
 0x175   : > { %584 = vst.msk [vmem:[%s1287_s22 + $0x58] sm:$0xff] %vm572_vm2, %v567_v47  ;;  %v538_v50 = vpop.xlane.xlu0 %537 }
 0x176   : > { %v514_v49 = vpop.xlane.xlu1 %513  ;;  %v566_v52 = vadd.f32 %v555_v37, %v538_v50 }
 0x177   : > { %v558_v51 = vadd.f32 %v555_v37, %v514_v49 }
 0x178   : > { %583 = vst.msk [vmem:[%s1287_s22 + $0x50] sm:$0xff] %vm572_vm2, %v566_v52 }
 0x179   : > { %575 = vst.msk [vmem:[%s1287_s22 + $0x10] sm:$0xff] %vm572_vm2, %v558_v51  ;;  %v520_v54 = vpop.xlane.xlu0 %519 }
 0x17a   : > { %v523_v53 = vpop.xlane.xlu1 %522  ;;  %v560_v56 = vadd.f32 %v555_v37, %v520_v54 }
 0x17b   : > { %v561_v55 = vadd.f32 %v555_v37, %v523_v53 }
 0x17c   : > { %577 = vst.msk [vmem:[%s1287_s22 + $0x20] sm:$0xff] %vm572_vm2, %v560_v56 }
 0x17d   : > { %578 = vst.msk [vmem:[%s1287_s22 + $0x28] sm:$0xff] %vm572_vm2, %v561_v55  ;;  %v544_v58 = vpop.xlane.xlu0 %543 }
 0x17e   : > { %v547_v57 = vpop.xlane.xlu1 %546  ;;  %v568_v60 = vadd.f32 %v555_v37, %v544_v58 }
 0x17f   : > { %v569_v59 = vadd.f32 %v555_v37, %v547_v57 }
 0x180   : > { %585 = vst.msk [vmem:[%s1287_s22 + $0x60] sm:$0xff] %vm572_vm2, %v568_v60 }
 0x181   : > { %586 = vst.msk [vmem:[%s1287_s22 + $0x68] sm:$0xff] %vm572_vm2, %v569_v59  ;;  %v526_v62 = vpop.xlane.xlu0 %525 }
 0x182   : > { %v529_v61 = vpop.xlane.xlu1 %528  ;;  %v562_v0 = vadd.f32 %v555_v37, %v526_v62 }
 0x183   : > { %v563_v63 = vadd.f32 %v555_v37, %v529_v61 }
 0x184   : > { %579 = vst.msk [vmem:[%s1287_s22 + $0x30] sm:$0xff] %vm572_vm2, %v562_v0 }
 0x185   : > { %580 = vst.msk [vmem:[%s1287_s22 + $0x38] sm:$0xff] %vm572_vm2, %v563_v63  ;;  %v550_v2 = vpop.xlane.xlu0 %549  ;;  %595 = sbr.rel (!%p1194_p4) target bundleno = 435 (0x1b3), region = 44 }
 0x186   : > { %v553_v1 = vpop.xlane.xlu1 %552  ;;  %v570_v4 = vadd.f32 %v555_v37, %v550_v2 }
 0x187   : > { %v571_v3 = vadd.f32 %v555_v37, %v553_v1 }
 0x188   : > { %587 = vst.msk [vmem:[%s1287_s22 + $0x70] sm:$0xff] %vm572_vm2, %v570_v4 }
 0x189   : > { %588 = vst.msk [vmem:[%s1287_s22 + $0x78] sm:$0xff] %vm572_vm2, %v571_v3 }
 0x18a   : > { %s1435_s20 = smov (!%p598_p8, %s597_s20), 16 }
 0x18b   : > { %s892_s30 = sshll.u32 %s1435_s20, 7 }
 0x18c   : > { %p895_p9 = scmp.eq.s32.totalorder %s892_s30, 0 }
 0x18d   : > { %s1334_s6 = sshrl.u32 (!%p895_p9), %s1435_s20, 4 }
 0x18e   : > { %606 = sbr.rel (%p895_p9) target bundleno = 435 (0x1b3), region = 48  ;;  %p896_p10 = scmp.le.s32.totalorder (!%p895_p9), %s1334_s6, 0 }
 0x193   : > { %821 = sbr.rel (%p896_p10) target bundleno = 418 (0x1a2), region = 124  ;;  %s1428_s4 = smov (!%p896_p10), %s1328_s29 }
 0x194   : > { %s1429_s27 = smov (!%p896_p10), %s1287_s22  ;;  %s1343_s7 = smov (!%p896_p10), 0  }
 0x195   : > { %s1345_s8 = smov (!%p896_p10), 0  }
 0x198 LB: >> { %v699_v5 = vld [vmem:[%s1110_s27] sm:$0xff]  ;;  %v701_v6 = vld [vmem:[%s1110_s27 + $0x8] sm:$0xff]  ;;  %v703_v7 = vld [vmem:[%s1110_s27 + $0x10] sm:$0xff]  ;;  %s731_s9 = sadd.s32 1, %s1114_s7  ;;  %s693_s8 = sadd.s32 1, %s1118_s8   ;;  %s1118_s8 = sphi %s1345_s8, %s693_s8   ;;  %s1114_s7 = sphi %s1343_s7, %s1430_s7   ;;  %s1110_s27 = sphi %s1429_s27, %s736_s27   ;;  %s1106_s4 = sphi %s1428_s4, %s737_s4  }
 0x199   : >> { %700 = vst [vmem:[%s1106_s4] sm:$0xff] %v699_v5  ;;  %702 = vst [vmem:[%s1106_s4 + $0x8] sm:$0xff] %v701_v6  ;;  %v705_v8 = vld [vmem:[%s1110_s27 + $0x18] sm:$0xff]  ;;  %v707_v9 = vld [vmem:[%s1110_s27 + $0x20] sm:$0xff]  ;;  %p732_p11 = scmp.ge.s32.totalorder %s731_s9, %s1334_s6  ;;  %p692_p12 = scmp.ge.s32.totalorder %s693_s8, %s1334_s6 }
 0x19a   : >> { %704 = vst [vmem:[%s1106_s4 + $0x10] sm:$0xff] %v703_v7  ;;  %v709_v10 = vld [vmem:[%s1110_s27 + $0x28] sm:$0xff]  ;;  %706 = vst [vmem:[%s1106_s4 + $0x18] sm:$0xff] %v705_v8  ;;  %v711_v11 = vld [vmem:[%s1110_s27 + $0x30] sm:$0xff] }
 0x19b   : >> { %708 = vst [vmem:[%s1106_s4 + $0x20] sm:$0xff] %v707_v9  ;;  %710 = vst [vmem:[%s1106_s4 + $0x28] sm:$0xff] %v709_v10  ;;  %v713_v12 = vld [vmem:[%s1110_s27 + $0x38] sm:$0xff]  ;;  %v715_v13 = vld [vmem:[%s1110_s27 + $0x40] sm:$0xff]  ;;  %s1437_s9 = smov (%p732_p11, %s731_s9), 0 }
 0x19c   : >> { %712 = vst [vmem:[%s1106_s4 + $0x30] sm:$0xff] %v711_v11  ;;  %714 = vst [vmem:[%s1106_s4 + $0x38] sm:$0xff] %v713_v12  ;;  %v717_v14 = vld [vmem:[%s1110_s27 + $0x48] sm:$0xff]  ;;  %v719_v15 = vld [vmem:[%s1110_s27 + $0x50] sm:$0xff]  ;;  %s897_s10 = sshll.u32 %s1437_s9, 7  ;;  %s1430_s7 = smov %s1437_s9 }
 0x19d   : >> { %716 = vst [vmem:[%s1106_s4 + $0x40] sm:$0xff] %v715_v13  ;;  %v721_v16 = vld [vmem:[%s1110_s27 + $0x58] sm:$0xff]  ;;  %718 = vst [vmem:[%s1106_s4 + $0x48] sm:$0xff] %v717_v14  ;;  %v723_v17 = vld [vmem:[%s1110_s27 + $0x60] sm:$0xff]  ;;  %695 = sbr.rel (!%p692_p12) target bundleno = 408 (0x198), region = 130 }
 0x19e   : >> { %720 = vst [vmem:[%s1106_s4 + $0x50] sm:$0xff] %v719_v15  ;;  %722 = vst [vmem:[%s1106_s4 + $0x58] sm:$0xff] %v721_v16  ;;  %v725_v19 = vld [vmem:[%s1110_s27 + $0x68] sm:$0xff]  ;;  %v727_v20 = vld [vmem:[%s1110_s27 + $0x70] sm:$0xff] }
 0x19f   : >> { %724 = vst [vmem:[%s1106_s4 + $0x60] sm:$0xff] %v723_v17  ;;  %726 = vst [vmem:[%s1106_s4 + $0x68] sm:$0xff] %v725_v19  ;;  %v729_v21 = vld [vmem:[%s1110_s27 + $0x78] sm:$0xff]  ;;  %s736_s27 = scalar_lea.vmem %s1287_s22, %s897_s10 [#allocation3]  }
 0x1a0   : >> { %728 = vst [vmem:[%s1106_s4 + $0x70] sm:$0xff] %v727_v20  ;;  %730 = vst [vmem:[%s1106_s4 + $0x78] sm:$0xff] %v729_v21  ;;  %s737_s4 = scalar_lea.vmem %s1328_s29, %s897_s10  }
 0x1a2 PF: > { %s1403_s11 = sand.u32 15, %s1435_s20   ;;  %s908_s12 = sshll.u32 %s1334_s6, 7 }
 0x1a3   : > { %s742_s13 = scalar_lea.vmem %s1287_s22, %s908_s12 [#allocation3]   ;;  %s744_s14 = scalar_lea.vmem %s1328_s29, %s908_s12  }
 0x1a4   : > { %p902_p13 = scmp.le.s32.totalorder %s1403_s11, 0 }
 0x1a5   : > { %s1120_s15 = smov (!%p902_p13), %s744_s14   ;;  %s1124_s16 = smov (!%p902_p13), %s742_s13  }
 0x1a6   : > { %835 = sbr.rel (%p902_p13) target bundleno = 435 (0x1b3), region = 135  ;;  %s1128_s17 = smov (!%p902_p13), 0  }
 0x1a7   : > { %s1132_s18 = smov (!%p902_p13), 0  }
 0x1ab LB: >> { %v754_v22 = vld [vmem:[%s1126_s16] sm:$0xff]  ;;  %s756_s19 = sadd.s32 1, %s1130_s17  ;;  %s748_s18 = sadd.s32 1, %s1134_s18   ;;  %s1134_s18 = sphi %s1132_s18, %s748_s18   ;;  %s1130_s17 = sphi %s1128_s17, %s1129_s17   ;;  %s1126_s16 = sphi %s1124_s16, %s761_s16   ;;  %s1122_s15 = sphi %s1120_s15, %s762_s15  }
 0x1ac   : >> { %755 = vst [vmem:[%s1122_s15] sm:$0xff] %v754_v22  ;;  %p757_p0 = scmp.ge.s32.totalorder %s756_s19, %s1403_s11  ;;  %p747_p1 = scmp.ge.s32.totalorder %s748_s18, %s1403_s11 }
 0x1ae   : >> { %s1439_s19 = smov (%p757_p0, %s756_s19), 0  ;;  %750 = sbr.rel (!%p747_p1) target bundleno = 427 (0x1ab), region = 141 }
 0x1af   : >> { %s903_s22 = sshll.u32 %s1439_s19, 3  ;;  %s1129_s17 = smov %s1439_s19  }
 0x1b0   : >> { %s761_s16 = scalar_lea.vmem %s742_s13, %s903_s22 [#allocation3]   ;;  %s762_s15 = scalar_lea.vmem %s744_s14, %s903_s22  }
 0x1b3 PF: > { %p13_p2 = scmp.ge.s32.totalorder %s1184_s23, 4   ;;  %s1431_s20 = smov %s1098_s21 }
 0x1b4   : > { %s1432_s21 = smov %s1192_s26  ;;  %s1433_s22 = smov %s1184_s23 }
 0x1b5   :  { %15 = sbr.rel (!%p13_p2) target bundleno = 4 (0x4), region = 152 }

</bundles_post_ra>
